<compile_context>
chip_gen: v6e
topology: v6e:2x2x1
jax: 0.10.0
libtpu: 0.0.40
codegen_flags: <defaults>
</compile_context>

<pallas_src>
import numpy as np
import jax
import jax.numpy as jnp
from jax import lax
from jax.experimental import pallas as pl
from jax.experimental.pallas import tpu as pltpu

_EPS = 1e-6
_LANES = 128
_MAX_ROWS_PER_BLOCK = 64        # 64 rows * 128 lanes = 8192 cameras per block


def _round_up(x, m):
    return ((x + m - 1) // m) * m


# ----------------------------- Pallas kernel ------------------------------ #
def _learn_pose_kernel(delta_ref, init_ref, o_ref):
    """c2w (16 row-major planes) for a block of cameras, cameras on lanes.

    delta_ref/init_ref: (6, rows, 128)  rows 0-2 = r, rows 3-5 = t
    o_ref:              (16, rows, 128) flattened 4x4 per camera
    """
    v = delta_ref[...] + init_ref[...]                  # (6, rows, 128)
    rx, ry, rz = v[0], v[1], v[2]                       # dense (rows, 128)
    tx, ty, tz = v[3], v[4], v[5]

    theta2 = rx * rx + ry * ry + rz * rz                # (rows, 128)
    safe_theta2 = jnp.maximum(theta2, _EPS)
    inv_theta = lax.rsqrt(safe_theta2)                  # fused sqrt + divide
    theta = safe_theta2 * inv_theta                     # sqrt(max(theta2,eps))
    cos_t = jnp.cos(theta)
    sin_t = jnp.sin(theta)
    omc = 1.0 - cos_t
    wx = rx * inv_theta
    wy = ry * inv_theta
    wz = rz * inv_theta

    # Rodrigues rotation entries (kornia axis_angle_to_rotation_matrix math)
    r00 = cos_t + wx * wx * omc
    r01 = wx * wy * omc - wz * sin_t
    r02 = wy * sin_t + wx * wz * omc
    r10 = wz * sin_t + wx * wy * omc
    r11 = cos_t + wy * wy * omc
    r12 = -wx * sin_t + wy * wz * omc
    r20 = -wy * sin_t + wx * wz * omc
    r21 = wx * sin_t + wy * wz * omc
    r22 = cos_t + wz * wz * omc

    # First-order Taylor branch for theta^2 <= eps (matches kornia fallback).
    use_rod = theta2 > _EPS
    one = jnp.ones_like(theta2)
    zero = jnp.zeros_like(theta2)
    e00 = jnp.where(use_rod, r00, one)
    e01 = jnp.where(use_rod, r01, -rz)
    e02 = jnp.where(use_rod, r02, ry)
    e10 = jnp.where(use_rod, r10, rz)
    e11 = jnp.where(use_rod, r11, one)
    e12 = jnp.where(use_rod, r12, -rx)
    e20 = jnp.where(use_rod, r20, -ry)
    e21 = jnp.where(use_rod, r21, rx)
    e22 = jnp.where(use_rod, r22, one)

    # 16 full-width (rows, 128) unmasked stores -- lane-dense output.
    planes = (e00, e01, e02, tx,
              e10, e11, e12, ty,
              e20, e21, e22, tz,
              zero, zero, zero, one)
    for j, p in enumerate(planes):
        o_ref[j] = p


# ------------------------------ Pallas wrapper ----------------------------- #
def _all_c2w_packed(delta_packed, init_packed):
    """(6, rows, 128) slabs -> (16, rows, 128) packed c2w table."""
    n_rows = delta_packed.shape[1]
    if n_rows <= _MAX_ROWS_PER_BLOCK:
        rows_per_block = n_rows            # single grid step
    else:
        rows_per_block = _MAX_ROWS_PER_BLOCK
        assert n_rows % rows_per_block == 0
    n_blocks = n_rows // rows_per_block

    return pl.pallas_call(
        _learn_pose_kernel,
        out_shape=jax.ShapeDtypeStruct((16, n_rows, _LANES), jnp.float32),
        grid=(n_blocks,),
        in_specs=[pl.BlockSpec((6, rows_per_block, _LANES),
                               lambda i: (0, i, 0))] * 2,
        out_specs=pl.BlockSpec((16, rows_per_block, _LANES),
                               lambda i: (0, i, 0)),
        compiler_params=pltpu.CompilerParams(
            dimension_semantics=("parallel",)),
    )(delta_packed, init_packed)


@jax.jit
def _learn_pose_forward(delta_packed, init_packed, cam_ids):
    """cam_ids: pre-clipped int32, scalar or (B,). Returns (4,4) / (B,4,4)."""
    flat = _all_c2w_packed(delta_packed, init_packed)   # (16, rows, 128)
    row = cam_ids // _LANES
    lane = cam_ids % _LANES
    vals = flat[:, row, lane]                           # (16,) or (16, B)
    return jnp.moveaxis(vals, 0, -1).reshape(cam_ids.shape + (4, 4))


# ----------------------- layout packing (init-time) ------------------------ #
def _num_rows(num_cams):
    n_rows = max(1, -(-num_cams // _LANES))
    if n_rows > _MAX_ROWS_PER_BLOCK:
        n_rows = _round_up(n_rows, _MAX_ROWS_PER_BLOCK)
    return n_rows


def _pack_lane_major(x, n_rows):
    """(N, 3) -> (3, n_rows, 128) with cameras on the lane axis."""
    n = x.shape[0]
    n_pad = n_rows * _LANES
    x = jnp.asarray(x, jnp.float32)
    x = jnp.pad(x, ((0, n_pad - n), (0, 0)))            # (n_pad, 3)
    return x.T.reshape(3, n_rows, _LANES)


# ------------------------ plain-JAX glue / reference ----------------------- #
def _axis_angle_to_rotation_matrix_ref(r, eps=_EPS):
    theta2 = jnp.sum(r * r)
    theta = jnp.sqrt(theta2)
    w = r / (theta + eps)
    K = jnp.array([[0.0, -w[2], w[1]],
                   [w[2], 0.0, -w[0]],
                   [-w[1], w[0], 0.0]], jnp.float32)
    R_rod = (jnp.cos(theta) * jnp.eye(3, dtype=jnp.float32)
             + jnp.sin(theta) * K
             + (1.0 - jnp.cos(theta)) * jnp.outer(w, w))
    R_tay = jnp.array([[1.0, -r[2], r[1]],
                       [r[2], 1.0, -r[0]],
                       [-r[1], r[0], 1.0]], jnp.float32)
    return jnp.where(theta2 > eps, R_rod, R_tay)


def make_c2w_ref(r, t):
    c2w = jnp.eye(4, dtype=jnp.float32)
    c2w = c2w.at[:3, :3].set(_axis_angle_to_rotation_matrix_ref(r))
    c2w = c2w.at[:3, 3].set(t)
    return c2w


def _rotation_matrix_to_axis_angle(R):
    # log map (init-time glue, mirrors rotation_matrix_to_axis_angle)
    # TODO(synk): degenerate near 180-degree rotations (sin(angle) -> 0);
    # fine for the moderate init poses used here.
    tr = jnp.trace(R)
    cos_a = jnp.clip((tr - 1.0) * 0.5, -1.0, 1.0)
    angle = jnp.arccos(cos_a)
    vee = jnp.array([R[2, 1] - R[1, 2], R[0, 2] - R[2, 0], R[1, 0] - R[0, 1]],
                    jnp.float32)
    sin_a = jnp.sin(angle)
    scale = jnp.where(sin_a > 1e-6, angle / (2.0 * sin_a), 0.5)
    return vee * scale


class LearnPose:
    """JAX/Pallas port of nerfmm LearnPose (forward semantics preserved)."""

    def __init__(self, num_cams, init_c2w):
        """init_c2w: (N, 4, 4) jnp.float32 array."""
        self.num_cams = num_cams
        self.init_c2w = jnp.asarray(init_c2w, jnp.float32)
        # recover per-camera axis-angle / translation from init_c2w (init glue)
        self.init_r = jnp.stack(
            [_rotation_matrix_to_axis_angle(self.init_c2w[i, :3, :3])
             for i in range(num_cams)]).astype(jnp.float32)
        self.init_t = self.init_c2w[:, :3, 3].astype(jnp.float32)
        # one-shot pad + lane-major layout for the fixed init tables
        self._n_rows = _num_rows(num_cams)
        self._init_packed = jnp.concatenate(
            [_pack_lane_major(self.init_r, self._n_rows),
             _pack_lane_major(self.init_t, self._n_rows)], axis=0)  # (6,rows,128)
        # learnable deltas, initialized to zero like the nn.Parameters
        self.set_params(jnp.zeros((num_cams, 3), jnp.float32),
                        jnp.zeros((num_cams, 3), jnp.float32))

    def set_params(self, r, t):
        """Set learnable deltas (N,3) each; packs into the kernel layout once."""
        self.r = jnp.asarray(r, jnp.float32)
        self.t = jnp.asarray(t, jnp.float32)
        self._delta_packed = jnp.concatenate(
            [_pack_lane_major(self.r, self._n_rows),
             _pack_lane_major(self.t, self._n_rows)], axis=0)       # (6,rows,128)

    def get_init_pose(self, cam_id):
        return self.init_c2w[cam_id]

    def __call__(self, cam_id):
        cam_ids = jnp.asarray(cam_id, dtype=jnp.int32)              # scalar or (B,)
        cam_ids = jnp.clip(cam_ids, 0, self.num_cams - 1)           # bounds-safe
        return _learn_pose_forward(self._delta_packed, self._init_packed,
                                   cam_ids)


# ---------------------------------- main ----------------------------------- #
if __name__ == "__main__":
    key = jax.random.PRNGKey(0)
    num_cams = 8
    k_r, k_t, k_dr, k_dt = jax.random.split(key, 4)

    # deterministic synthetic init_c2w (N, 4, 4)
    axis_angles = jax.random.uniform(k_r, (num_cams, 3), jnp.float32, -1.0, 1.0)
    trans = jax.random.uniform(k_t, (num_cams, 3), jnp.float32, -2.0, 2.0)
    init_c2w = jnp.stack([make_c2w_ref(axis_angles[i], trans[i])
                          for i in range(num_cams)])

    pose = LearnPose(num_cams, init_c2w)
    cam_id = 3

    # zero learnable deltas -> should reproduce init_c2w[cam_id]
    c2w = pose(cam_id)
    jax.block_until_ready(c2w)
    assert c2w.shape == (4, 4)
    assert np.allclose(np.asarray(c2w), np.asarray(init_c2w[cam_id]), atol=1e-4)

    # nonzero learnable deltas -> compare against pure-JAX reference forward
    pose.set_params(0.05 * jax.random.normal(k_dr, (num_cams, 3), jnp.float32),
                    0.05 * jax.random.normal(k_dt, (num_cams, 3), jnp.float32))
    c2w2 = pose(cam_id)
    jax.block_until_ready(c2w2)
    ref2 = make_c2w_ref(pose.r[cam_id] + pose.init_r[cam_id],
                        pose.t[cam_id] + pose.init_t[cam_id])
    assert np.allclose(np.asarray(c2w2), np.asarray(ref2), atol=1e-4)

    # batched cam_ids also work (still a single batched pallas_call)
    cam_ids = jnp.array([0, 3, 7], jnp.int32)
    c2w_batch = pose(cam_ids)
    jax.block_until_ready(c2w_batch)
    ref_batch = jnp.stack([make_c2w_ref(pose.r[i] + pose.init_r[i],
                                        pose.t[i] + pose.init_t[i])
                           for i in (0, 3, 7)])
    assert np.allclose(np.asarray(c2w_batch), np.asarray(ref_batch), atol=1e-4)

    print("KERNEL_OK")
</pallas_src>

<mosaic_0001>
module attributes {stable_mosaic.version = 11 : i64} {
  func.func @_learn_pose_kernel(%arg0: i32, %arg1: memref<6x1x128xf32, #tpu.memory_space<vmem>>, %arg2: memref<6x1x128xf32, #tpu.memory_space<vmem>>, %arg3: memref<16x1x128xf32, #tpu.memory_space<vmem>>) attributes {dimension_semantics = [#tpu.dimension_semantics<parallel>], iteration_bounds = array<i64: 1>, scalar_prefetch = 0 : i64, scratch_operands = 0 : i64, tpu.core_type = #tpu.core_type<tc>, window_params = [{transform_indices = @transform_0, window_bounds = array<i64: 6, 1, 128>}, {transform_indices = @transform_1, window_bounds = array<i64: 6, 1, 128>}, {transform_indices = @transform_2, window_bounds = array<i64: 16, 1, 128>}]} {
    %c0 = arith.constant 0 : index
    %c0_0 = arith.constant 0 : index
    %c0_1 = arith.constant 0 : index
    %0 = vector.load %arg1[%c0, %c0_0, %c0_1] : memref<6x1x128xf32, #tpu.memory_space<vmem>>, vector<6x1x128xf32>
    %c0_2 = arith.constant 0 : index
    %c0_3 = arith.constant 0 : index
    %c0_4 = arith.constant 0 : index
    %1 = vector.load %arg2[%c0_2, %c0_3, %c0_4] : memref<6x1x128xf32, #tpu.memory_space<vmem>>, vector<6x1x128xf32>
    %2 = arith.addf %0, %1 : vector<6x1x128xf32>
    %3 = vector.extract_strided_slice %2 {offsets = [0, 0, 0], sizes = [1, 1, 128], strides = [1, 1, 1]} : vector<6x1x128xf32> to vector<1x1x128xf32>
    %4 = vector.shape_cast %3 : vector<1x1x128xf32> to vector<1x128xf32>
    %5 = vector.extract_strided_slice %2 {offsets = [1, 0, 0], sizes = [1, 1, 128], strides = [1, 1, 1]} : vector<6x1x128xf32> to vector<1x1x128xf32>
    %6 = vector.shape_cast %5 : vector<1x1x128xf32> to vector<1x128xf32>
    %7 = vector.extract_strided_slice %2 {offsets = [2, 0, 0], sizes = [1, 1, 128], strides = [1, 1, 1]} : vector<6x1x128xf32> to vector<1x1x128xf32>
    %8 = vector.shape_cast %7 : vector<1x1x128xf32> to vector<1x128xf32>
    %9 = vector.extract_strided_slice %2 {offsets = [3, 0, 0], sizes = [1, 1, 128], strides = [1, 1, 1]} : vector<6x1x128xf32> to vector<1x1x128xf32>
    %10 = vector.shape_cast %9 : vector<1x1x128xf32> to vector<1x128xf32>
    %11 = vector.extract_strided_slice %2 {offsets = [4, 0, 0], sizes = [1, 1, 128], strides = [1, 1, 1]} : vector<6x1x128xf32> to vector<1x1x128xf32>
    %12 = vector.shape_cast %11 : vector<1x1x128xf32> to vector<1x128xf32>
    %13 = vector.extract_strided_slice %2 {offsets = [5, 0, 0], sizes = [1, 1, 128], strides = [1, 1, 1]} : vector<6x1x128xf32> to vector<1x1x128xf32>
    %14 = vector.shape_cast %13 : vector<1x1x128xf32> to vector<1x128xf32>
    %15 = arith.mulf %4, %4 : vector<1x128xf32>
    %16 = arith.mulf %6, %6 : vector<1x128xf32>
    %17 = arith.addf %15, %16 : vector<1x128xf32>
    %18 = arith.mulf %8, %8 : vector<1x128xf32>
    %19 = arith.addf %17, %18 : vector<1x128xf32>
    %cst = arith.constant 9.99999997E-7 : f32
    %20 = vector.broadcast %cst : f32 to vector<1x128xf32>
    %21 = arith.maximumf %19, %20 : vector<1x128xf32>
    %22 = math.rsqrt %21 : vector<1x128xf32>
    %23 = arith.mulf %21, %22 : vector<1x128xf32>
    %24 = math.cos %23 : vector<1x128xf32>
    %25 = math.sin %23 : vector<1x128xf32>
    %cst_5 = arith.constant 1.000000e+00 : f32
    %26 = vector.broadcast %cst_5 : f32 to vector<1x128xf32>
    %27 = arith.subf %26, %24 : vector<1x128xf32>
    %28 = arith.mulf %4, %22 : vector<1x128xf32>
    %29 = arith.mulf %6, %22 : vector<1x128xf32>
    %30 = arith.mulf %8, %22 : vector<1x128xf32>
    %31 = arith.mulf %28, %28 : vector<1x128xf32>
    %32 = arith.mulf %31, %27 : vector<1x128xf32>
    %33 = arith.addf %24, %32 : vector<1x128xf32>
    %34 = arith.mulf %28, %29 : vector<1x128xf32>
    %35 = arith.mulf %34, %27 : vector<1x128xf32>
    %36 = arith.mulf %30, %25 : vector<1x128xf32>
    %37 = arith.subf %35, %36 : vector<1x128xf32>
    %38 = arith.mulf %29, %25 : vector<1x128xf32>
    %39 = arith.mulf %28, %30 : vector<1x128xf32>
    %40 = arith.mulf %39, %27 : vector<1x128xf32>
    %41 = arith.addf %38, %40 : vector<1x128xf32>
    %42 = arith.mulf %30, %25 : vector<1x128xf32>
    %43 = arith.mulf %28, %29 : vector<1x128xf32>
    %44 = arith.mulf %43, %27 : vector<1x128xf32>
    %45 = arith.addf %42, %44 : vector<1x128xf32>
    %46 = arith.mulf %29, %29 : vector<1x128xf32>
    %47 = arith.mulf %46, %27 : vector<1x128xf32>
    %48 = arith.addf %24, %47 : vector<1x128xf32>
    %cst_6 = arith.constant 0.000000e+00 : f32
    %49 = vector.broadcast %cst_6 : f32 to vector<1x128xf32>
    %50 = arith.subf %49, %28 : vector<1x128xf32>
    %51 = arith.mulf %50, %25 : vector<1x128xf32>
    %52 = arith.mulf %29, %30 : vector<1x128xf32>
    %53 = arith.mulf %52, %27 : vector<1x128xf32>
    %54 = arith.addf %51, %53 : vector<1x128xf32>
    %cst_7 = arith.constant 0.000000e+00 : f32
    %55 = vector.broadcast %cst_7 : f32 to vector<1x128xf32>
    %56 = arith.subf %55, %29 : vector<1x128xf32>
    %57 = arith.mulf %56, %25 : vector<1x128xf32>
    %58 = arith.mulf %28, %30 : vector<1x128xf32>
    %59 = arith.mulf %58, %27 : vector<1x128xf32>
    %60 = arith.addf %57, %59 : vector<1x128xf32>
    %61 = arith.mulf %28, %25 : vector<1x128xf32>
    %62 = arith.mulf %29, %30 : vector<1x128xf32>
    %63 = arith.mulf %62, %27 : vector<1x128xf32>
    %64 = arith.addf %61, %63 : vector<1x128xf32>
    %65 = arith.mulf %30, %30 : vector<1x128xf32>
    %66 = arith.mulf %65, %27 : vector<1x128xf32>
    %67 = arith.addf %24, %66 : vector<1x128xf32>
    %cst_8 = arith.constant 9.99999997E-7 : f32
    %68 = vector.broadcast %cst_8 : f32 to vector<1x128xf32>
    %69 = arith.cmpf ogt, %19, %68 : vector<1x128xf32>
    %cst_9 = arith.constant 1.000000e+00 : f32
    %70 = vector.broadcast %cst_9 : f32 to vector<1x128xf32>
    %cst_10 = arith.constant 0.000000e+00 : f32
    %71 = vector.broadcast %cst_10 : f32 to vector<1x128xf32>
    %72 = arith.select %69, %33, %70 : vector<1x128xi1>, vector<1x128xf32>
    %cst_11 = arith.constant 0.000000e+00 : f32
    %73 = vector.broadcast %cst_11 : f32 to vector<1x128xf32>
    %74 = arith.subf %73, %8 : vector<1x128xf32>
    %75 = arith.select %69, %37, %74 : vector<1x128xi1>, vector<1x128xf32>
    %76 = arith.select %69, %41, %6 : vector<1x128xi1>, vector<1x128xf32>
    %77 = arith.select %69, %45, %8 : vector<1x128xi1>, vector<1x128xf32>
    %78 = arith.select %69, %48, %70 : vector<1x128xi1>, vector<1x128xf32>
    %cst_12 = arith.constant 0.000000e+00 : f32
    %79 = vector.broadcast %cst_12 : f32 to vector<1x128xf32>
    %80 = arith.subf %79, %4 : vector<1x128xf32>
    %81 = arith.select %69, %54, %80 : vector<1x128xi1>, vector<1x128xf32>
    %cst_13 = arith.constant 0.000000e+00 : f32
    %82 = vector.broadcast %cst_13 : f32 to vector<1x128xf32>
    %83 = arith.subf %82, %6 : vector<1x128xf32>
    %84 = arith.select %69, %60, %83 : vector<1x128xi1>, vector<1x128xf32>
    %85 = arith.select %69, %64, %4 : vector<1x128xi1>, vector<1x128xf32>
    %86 = arith.select %69, %67, %70 : vector<1x128xi1>, vector<1x128xf32>
    %c0_14 = arith.constant 0 : index
    %c0_15 = arith.constant 0 : index
    %c0_16 = arith.constant 0 : index
    %87 = vector.load %arg3[%c0_14, %c0_15, %c0_16] : memref<16x1x128xf32, #tpu.memory_space<vmem>>, vector<1x1x128xf32>
    %88 = vector.shape_cast %87 : vector<1x1x128xf32> to vector<1x128xf32>
    %89 = vector.shape_cast %72 : vector<1x128xf32> to vector<1x1x128xf32>
    tpu.vector_store %arg3[%c0_14, %c0_15, %c0_16], %89 {strides = array<i32>} : memref<16x1x128xf32, #tpu.memory_space<vmem>>, vector<1x1x128xf32>,
    %c1 = arith.constant 1 : index
    %c0_17 = arith.constant 0 : index
    %c0_18 = arith.constant 0 : index
    %90 = vector.load %arg3[%c1, %c0_17, %c0_18] : memref<16x1x128xf32, #tpu.memory_space<vmem>>, vector<1x1x128xf32>
    %91 = vector.shape_cast %90 : vector<1x1x128xf32> to vector<1x128xf32>
    %92 = vector.shape_cast %75 : vector<1x128xf32> to vector<1x1x128xf32>
    tpu.vector_store %arg3[%c1, %c0_17, %c0_18], %92 {strides = array<i32>} : memref<16x1x128xf32, #tpu.memory_space<vmem>>, vector<1x1x128xf32>,
    %c2 = arith.constant 2 : index
    %c0_19 = arith.constant 0 : index
    %c0_20 = arith.constant 0 : index
    %93 = vector.load %arg3[%c2, %c0_19, %c0_20] : memref<16x1x128xf32, #tpu.memory_space<vmem>>, vector<1x1x128xf32>
    %94 = vector.shape_cast %93 : vector<1x1x128xf32> to vector<1x128xf32>
    %95 = vector.shape_cast %76 : vector<1x128xf32> to vector<1x1x128xf32>
    tpu.vector_store %arg3[%c2, %c0_19, %c0_20], %95 {strides = array<i32>} : memref<16x1x128xf32, #tpu.memory_space<vmem>>, vector<1x1x128xf32>,
    %c3 = arith.constant 3 : index
    %c0_21 = arith.constant 0 : index
    %c0_22 = arith.constant 0 : index
    %96 = vector.load %arg3[%c3, %c0_21, %c0_22] : memref<16x1x128xf32, #tpu.memory_space<vmem>>, vector<1x1x128xf32>
    %97 = vector.shape_cast %96 : vector<1x1x128xf32> to vector<1x128xf32>
    %98 = vector.shape_cast %10 : vector<1x128xf32> to vector<1x1x128xf32>
    tpu.vector_store %arg3[%c3, %c0_21, %c0_22], %98 {strides = array<i32>} : memref<16x1x128xf32, #tpu.memory_space<vmem>>, vector<1x1x128xf32>,
    %c4 = arith.constant 4 : index
    %c0_23 = arith.constant 0 : index
    %c0_24 = arith.constant 0 : index
    %99 = vector.load %arg3[%c4, %c0_23, %c0_24] : memref<16x1x128xf32, #tpu.memory_space<vmem>>, vector<1x1x128xf32>
    %100 = vector.shape_cast %99 : vector<1x1x128xf32> to vector<1x128xf32>
    %101 = vector.shape_cast %77 : vector<1x128xf32> to vector<1x1x128xf32>
    tpu.vector_store %arg3[%c4, %c0_23, %c0_24], %101 {strides = array<i32>} : memref<16x1x128xf32, #tpu.memory_space<vmem>>, vector<1x1x128xf32>,
    %c5 = arith.constant 5 : index
    %c0_25 = arith.constant 0 : index
    %c0_26 = arith.constant 0 : index
    %102 = vector.load %arg3[%c5, %c0_25, %c0_26] : memref<16x1x128xf32, #tpu.memory_space<vmem>>, vector<1x1x128xf32>
    %103 = vector.shape_cast %102 : vector<1x1x128xf32> to vector<1x128xf32>
    %104 = vector.shape_cast %78 : vector<1x128xf32> to vector<1x1x128xf32>
    tpu.vector_store %arg3[%c5, %c0_25, %c0_26], %104 {strides = array<i32>} : memref<16x1x128xf32, #tpu.memory_space<vmem>>, vector<1x1x128xf32>,
    %c6 = arith.constant 6 : index
    %c0_27 = arith.constant 0 : index
    %c0_28 = arith.constant 0 : index
    %105 = vector.load %arg3[%c6, %c0_27, %c0_28] : memref<16x1x128xf32, #tpu.memory_space<vmem>>, vector<1x1x128xf32>
    %106 = vector.shape_cast %105 : vector<1x1x128xf32> to vector<1x128xf32>
    %107 = vector.shape_cast %81 : vector<1x128xf32> to vector<1x1x128xf32>
    tpu.vector_store %arg3[%c6, %c0_27, %c0_28], %107 {strides = array<i32>} : memref<16x1x128xf32, #tpu.memory_space<vmem>>, vector<1x1x128xf32>,
    %c7 = arith.constant 7 : index
    %c0_29 = arith.constant 0 : index
    %c0_30 = arith.constant 0 : index
    %108 = vector.load %arg3[%c7, %c0_29, %c0_30] : memref<16x1x128xf32, #tpu.memory_space<vmem>>, vector<1x1x128xf32>
    %109 = vector.shape_cast %108 : vector<1x1x128xf32> to vector<1x128xf32>
    %110 = vector.shape_cast %12 : vector<1x128xf32> to vector<1x1x128xf32>
    tpu.vector_store %arg3[%c7, %c0_29, %c0_30], %110 {strides = array<i32>} : memref<16x1x128xf32, #tpu.memory_space<vmem>>, vector<1x1x128xf32>,
    %c8 = arith.constant 8 : index
    %c0_31 = arith.constant 0 : index
    %c0_32 = arith.constant 0 : index
    %111 = vector.load %arg3[%c8, %c0_31, %c0_32] : memref<16x1x128xf32, #tpu.memory_space<vmem>>, vector<1x1x128xf32>
    %112 = vector.shape_cast %111 : vector<1x1x128xf32> to vector<1x128xf32>
    %113 = vector.shape_cast %84 : vector<1x128xf32> to vector<1x1x128xf32>
    tpu.vector_store %arg3[%c8, %c0_31, %c0_32], %113 {strides = array<i32>} : memref<16x1x128xf32, #tpu.memory_space<vmem>>, vector<1x1x128xf32>,
    %c9 = arith.constant 9 : index
    %c0_33 = arith.constant 0 : index
    %c0_34 = arith.constant 0 : index
    %114 = vector.load %arg3[%c9, %c0_33, %c0_34] : memref<16x1x128xf32, #tpu.memory_space<vmem>>, vector<1x1x128xf32>
    %115 = vector.shape_cast %114 : vector<1x1x128xf32> to vector<1x128xf32>
    %116 = vector.shape_cast %85 : vector<1x128xf32> to vector<1x1x128xf32>
    tpu.vector_store %arg3[%c9, %c0_33, %c0_34], %116 {strides = array<i32>} : memref<16x1x128xf32, #tpu.memory_space<vmem>>, vector<1x1x128xf32>,
    %c10 = arith.constant 10 : index
    %c0_35 = arith.constant 0 : index
    %c0_36 = arith.constant 0 : index
    %117 = vector.load %arg3[%c10, %c0_35, %c0_36] : memref<16x1x128xf32, #tpu.memory_space<vmem>>, vector<1x1x128xf32>
    %118 = vector.shape_cast %117 : vector<1x1x128xf32> to vector<1x128xf32>
    %119 = vector.shape_cast %86 : vector<1x128xf32> to vector<1x1x128xf32>
    tpu.vector_store %arg3[%c10, %c0_35, %c0_36], %119 {strides = array<i32>} : memref<16x1x128xf32, #tpu.memory_space<vmem>>, vector<1x1x128xf32>,
    %c11 = arith.constant 11 : index
    %c0_37 = arith.constant 0 : index
    %c0_38 = arith.constant 0 : index
    %120 = vector.load %arg3[%c11, %c0_37, %c0_38] : memref<16x1x128xf32, #tpu.memory_space<vmem>>, vector<1x1x128xf32>
    %121 = vector.shape_cast %120 : vector<1x1x128xf32> to vector<1x128xf32>
    %122 = vector.shape_cast %14 : vector<1x128xf32> to vector<1x1x128xf32>
    tpu.vector_store %arg3[%c11, %c0_37, %c0_38], %122 {strides = array<i32>} : memref<16x1x128xf32, #tpu.memory_space<vmem>>, vector<1x1x128xf32>,
    %c12 = arith.constant 12 : index
    %c0_39 = arith.constant 0 : index
    %c0_40 = arith.constant 0 : index
    %123 = vector.load %arg3[%c12, %c0_39, %c0_40] : memref<16x1x128xf32, #tpu.memory_space<vmem>>, vector<1x1x128xf32>
    %124 = vector.shape_cast %123 : vector<1x1x128xf32> to vector<1x128xf32>
    %125 = vector.shape_cast %71 : vector<1x128xf32> to vector<1x1x128xf32>
    tpu.vector_store %arg3[%c12, %c0_39, %c0_40], %125 {strides = array<i32>} : memref<16x1x128xf32, #tpu.memory_space<vmem>>, vector<1x1x128xf32>,
    %c13 = arith.constant 13 : index
    %c0_41 = arith.constant 0 : index
    %c0_42 = arith.constant 0 : index
    %126 = vector.load %arg3[%c13, %c0_41, %c0_42] : memref<16x1x128xf32, #tpu.memory_space<vmem>>, vector<1x1x128xf32>
    %127 = vector.shape_cast %126 : vector<1x1x128xf32> to vector<1x128xf32>
    %128 = vector.shape_cast %71 : vector<1x128xf32> to vector<1x1x128xf32>
    tpu.vector_store %arg3[%c13, %c0_41, %c0_42], %128 {strides = array<i32>} : memref<16x1x128xf32, #tpu.memory_space<vmem>>, vector<1x1x128xf32>,
    %c14 = arith.constant 14 : index
    %c0_43 = arith.constant 0 : index
    %c0_44 = arith.constant 0 : index
    %129 = vector.load %arg3[%c14, %c0_43, %c0_44] : memref<16x1x128xf32, #tpu.memory_space<vmem>>, vector<1x1x128xf32>
    %130 = vector.shape_cast %129 : vector<1x1x128xf32> to vector<1x128xf32>
    %131 = vector.shape_cast %71 : vector<1x128xf32> to vector<1x1x128xf32>
    tpu.vector_store %arg3[%c14, %c0_43, %c0_44], %131 {strides = array<i32>} : memref<16x1x128xf32, #tpu.memory_space<vmem>>, vector<1x1x128xf32>,
    %c15 = arith.constant 15 : index
    %c0_45 = arith.constant 0 : index
    %c0_46 = arith.constant 0 : index
    %132 = vector.load %arg3[%c15, %c0_45, %c0_46] : memref<16x1x128xf32, #tpu.memory_space<vmem>>, vector<1x1x128xf32>
    %133 = vector.shape_cast %132 : vector<1x1x128xf32> to vector<1x128xf32>
    %134 = vector.shape_cast %70 : vector<1x128xf32> to vector<1x1x128xf32>
    tpu.vector_store %arg3[%c15, %c0_45, %c0_46], %134 {strides = array<i32>} : memref<16x1x128xf32, #tpu.memory_space<vmem>>, vector<1x1x128xf32>,
    return
  }
  func.func @transform_0(%arg0: i32) -> (i32, i32, i32) {
    %c0_i32 = arith.constant 0 : i32
    %c0_i32_0 = arith.constant 0 : i32
    %c0_i32_1 = arith.constant 0 : i32
    return %c0_i32, %arg0, %c0_i32_0 : i32, i32, i32
  }
  func.func @transform_1(%arg0: i32) -> (i32, i32, i32) {
    %c0_i32 = arith.constant 0 : i32
    %c0_i32_0 = arith.constant 0 : i32
    %c0_i32_1 = arith.constant 0 : i32
    return %c0_i32, %arg0, %c0_i32_0 : i32, i32, i32
  }
  func.func @transform_2(%arg0: i32) -> (i32, i32, i32) {
    %c0_i32 = arith.constant 0 : i32
    %c0_i32_0 = arith.constant 0 : i32
    %c0_i32_1 = arith.constant 0 : i32
    return %c0_i32, %arg0, %c0_i32_0 : i32, i32, i32
  }
}

</mosaic_0001>

<bundles_post_ra>
// kernel: squeeze.1
= control target key start
LH: loop header
LB: loop body
LE: loop exit
PB: predicated region body
PF: predicated region fallthrough
CT: control target
= control target key end

     0   :  { %s93_s0 = inlined_call_operand.vmem [shape: f32[16], index: 0, kind: input, shape index: {}]   ;;  %s94_s1 = inlined_call_operand.hbm [shape: f32[4,4], index: 1, kind: output, shape index: {}]  }
   0x1   :  { %v6_v0 = vld [vmem:[%s93_s0] sm:$0x1] }
   0x2   :  { %7 = vst [vmem:[#allocation3] sm:$0x1] %v6_v0 }
   0x3   :  { %2 = vsyncpa [#allocation1], 0  ;;  %s73_s0 = smov 124   ;;  %s74_s8 = smov 116   ;;  %vm9_vm0 = vcmask 31744  }
   0x4   :  { %s75_s9 = smov 120   ;;  %s76_s10 = smov [#allocation0]  }
   0x5   :  { %s41_s11 = sshll.u32 %s76_s10, 4  ;;  %s42_s11 = int_to_ptr.vmem [resolvable:$true] %s41_s11 }
   0x6   :  { %s51_s12 = scalar_lea.vmem %s42_s11, 64  ;;  %p56_p1 = scmp.lt.s32.totalorder %s42_s11, %s42_s11 }
   0x7   :  { %p52_p0 = scmp.ne.s32.totalorder %s42_s11, %s51_s12  ;;  %p57_p2 = scmp.lt.s32.totalorder %s51_s12, %s51_s12 }
   0x9   :  { %v11_v1 = vld [vmem:[#allocation3] sm:$0x1]   ;;  %p58_p3 = por %p57_p2, %p56_p1 }
   0xa   :  { %v23_v2 = vld [vmem:[#allocation3] sm:$0x1]   ;;  %12 = vrot.lane.b32.xlu0 %v11_v1, %s73_s0 }
   0xb   :  { %24 = vrot.lane.b32.xlu1 %v23_v2, %s74_s8  ;;  %v8_v3 = vld [vmem:[#allocation3] sm:$0x1]   ;;  %p59_p4 = pnand %p58_p3, %p52_p0 }
   0xc   :  { %v17_v4 = vld [vmem:[#allocation3] sm:$0x1]   ;;  %10 = vst.msk [vmem:[#allocation2] sm:$0x1] %vm9_vm0, %v8_v3  }
   0xe   :  { %18 = vrot.lane.b32.xlu0 %v17_v4, %s75_s9 }
  0x7c   :  { %v13_v5 = vpop.permute.xlu0 %12  }
  0x7d   :  { %v25_v6 = vpop.permute.xlu1 %24   ;;  %16 = vst.msk [vmem:[#allocation2 + $0x1] sm:$0x1] %vm9_vm0, %v13_v5  }
  0x7e   :  { %28 = vst.msk [vmem:[#allocation2 + $0x3] sm:$0x1] %vm9_vm0, %v25_v6  }
  0x80   :  { %v19_v7 = vpop.permute.xlu0 %18  }
  0x81   :  { %22 = vst.msk [vmem:[#allocation2 + $0x2] sm:$0x1] %vm9_vm0, %v19_v7  }
  0x88   :  { %v33_v8 = vld [vmem:[#allocation2] sm:$0xf] }
  0x89   :  { %36 = vst [vmem:[#allocation0] sm:$0xf] %v33_v8 }
  0x8a   :  { %62 = shalt.err (!%p59_p4)
}
  0x8b   :  { %44 = dma.vmem_to_hbm [thread:$0]  %s42_s11, 64, %s94_s1, [#allocation1]  }
  0x8c   :  { %71 = dma.done.wait [#allocation1], 64  }
  0x8d   :  { %72 = vsyncadd [#allocation1], 4294967232 }
  0x8e   :  { %46 = vsyncpa [#allocation1], 1 }

// kernel: _learn_pose_forward.1
= control target key start
LH: loop header
LB: loop body
LE: loop exit
PB: predicated region body
PF: predicated region fallthrough
CT: control target
= control target key end

     0   :  { %v365_v22 = vmov 0.0   ;;  %v366_v23 = vmov 1.0   ;;  %v367_v39 = vmov 683565275   ;;  %v368_v41 = vmov 2475754826   ;;  %s546_s0 = inlined_call_operand.vmem [shape: f32[6,1,128], index: 0, kind: input, shape index: {}]   ;;  %s547_s1 = inlined_call_operand.vmem [shape: f32[6,1,128], index: 1, kind: input, shape index: {}]   ;;  %s548_s2 = inlined_call_operand.vmem [shape: f32[16,1,128], index: 2, kind: output, shape index: {}]  }
   0x1   :  { %v11_v0 = vld [vmem:[%s546_s0] sm:$0x1]  ;;  %v12_v1 = vld [vmem:[%s546_s0 + $0x1] sm:$0x1]  ;;  %v13_v2 = vld [vmem:[%s546_s0 + $0x2] sm:$0x1] }
   0x2   :  { %v17_v3 = vld [vmem:[%s547_s1] sm:$0x1]  ;;  %v18_v4 = vld [vmem:[%s547_s1 + $0x1] sm:$0x1]  ;;  %v19_v5 = vld [vmem:[%s547_s1 + $0x2] sm:$0x1] }
   0x3   :  { %v406_v6 = vadd.f32 %v17_v3, %v11_v0  ;;  %v408_v7 = vadd.f32 %v18_v4, %v12_v1  ;;  %v410_v8 = vadd.f32 %v19_v5, %v13_v2  ;;  %v14_v9 = vld [vmem:[%s546_s0 + $0x3] sm:$0x1]  ;;  %v15_v12 = vld [vmem:[%s546_s0 + $0x4] sm:$0x1]  ;;  %v16_v17 = vld [vmem:[%s546_s0 + $0x5] sm:$0x1] }
   0x4   :  { %v20_v10 = vld [vmem:[%s547_s1 + $0x3] sm:$0x1]  ;;  %v21_v16 = vld [vmem:[%s547_s1 + $0x4] sm:$0x1]  ;;  %v22_v19 = vld [vmem:[%s547_s1 + $0x5] sm:$0x1] }
   0x5   :  { %v26_v11 = vadd.f32 %v20_v10, %v14_v9  ;;  %v29_v13 = vmul.f32 %v406_v6, %v406_v6  ;;  %v30_v14 = vmul.f32 %v408_v7, %v408_v7  ;;  %v32_v15 = vmul.f32 %v410_v8, %v410_v8  ;;  %343 = vst [vmem:[%s548_s2 + $0xc] sm:$0x1] %v365_v22 }
   0x6   :  { %v27_v18 = vadd.f32 %v21_v16, %v15_v12  ;;  %v28_v21 = vadd.f32 %v22_v19, %v16_v17  ;;  %344 = vst [vmem:[%s548_s2 + $0xd] sm:$0x1] %v365_v22  ;;  %345 = vst [vmem:[%s548_s2 + $0xe] sm:$0x1] %v365_v22  ;;  %v369_v43 = vmov 2131351028  }
   0x7   :  { %334 = vst [vmem:[%s548_s2 + $0x3] sm:$0x1] %v26_v11  ;;  %v31_v20 = vadd.f32 %v30_v14, %v29_v13  ;;  %346 = vst [vmem:[%s548_s2 + $0xf] sm:$0x1] %v366_v23  ;;  %v370_v45 = vmov 2102212464  }
   0x8   :  { %338 = vst [vmem:[%s548_s2 + $0x7] sm:$0x1] %v27_v18  ;;  %342 = vst [vmem:[%s548_s2 + $0xb] sm:$0x1] %v28_v21  ;;  %v371_v47 = vmov 920167782  }
   0x9   :  { %v454_v24 = vadd.f32 %v32_v15, %v31_v20  ;;  %v372_v54 = vmov 1326507024  }
   0xb   :  { %v34_v25 = vmax.f32 %v454_v24, 1e-06 }
   0xd   :  { %359 = vrsqrt.f32 %v34_v25 }
  0x1a   :  { %v460_v26 = vpop.eup %359 }
  0x1b   :  { %v463_v27 = vmul.f32 %v460_v26, %v34_v25 }
  0x1d   :  { %v40_v28 = vand.u32 2139095040, %v463_v27  ;;  %v37_v30 = vand.u32 2147483647, %v463_v27  ;;  %vm39_vm7 = vcmp.lt.s32.totalorder %v463_v27, 0  ;;  %vm129_vm13 = vweird.f32 %v463_v27 }
  0x1f   :  { %v41_v29 = vshrl.u32 %v40_v28, 23  ;;  %v44_v33 = vand.u32 8388607, %v37_v30  ;;  %vm38_vm8 = vcmp.le.f32.partialorder %v37_v30, 0.7853982  ;;  %v246_v30 = vmul.f32 %v460_v26, %v408_v7 }
  0x21   :  { %v324_v31 = vadd.s32 4294967169, %v41_v29  ;;  %v45_v36 = vor.u32 8388608, %v44_v33 }
  0x23   :  { %v47_v32 = vadd.s32 1, %v324_v31  ;;  %v85_v56 = vshll.u32 %v45_v36, 8 }
  0x25   :  { %vm48_vm0 = vcmp.gt.s32.totalorder %v47_v32, 0 }
  0x26   :  { %v49_v34 = vsel %vm48_vm0, %v47_v32, 0  ;;  %vm276_vm0 = vcmp.gt.f32.partialorder %v454_v24, 1e-06 }
  0x27   :  { %v51_v35 = vand.u32 31, %v49_v34  ;;  %v50_v37 = vshrl.u32 %v49_v34, 5 }
  0x29   :  { %v52_v38 = vsub.s32 32, %v51_v35  ;;  %v54_v40 = vshll.u32 %v367_v39, %v51_v35  ;;  %v57_v42 = vshll.u32 %v368_v41, %v51_v35  ;;  %v60_v44 = vshll.u32 %v369_v43, %v51_v35 }
  0x2a   :  { %v63_v46 = vshll.u32 %v370_v45, %v51_v35  ;;  %v66_v48 = vshll.u32 %v371_v47, %v51_v35  ;;  %vm69_vm1 = vcmp.lt.s32.totalorder %v50_v37, 1  ;;  %vm72_vm2 = vcmp.lt.s32.totalorder %v50_v37, 4 }
  0x2b   :  { %v53_v49 = vshrl.u32 %v367_v39, %v52_v38  ;;  %v55_v50 = vshrl.u32 %v368_v41, %v52_v38  ;;  %v58_v51 = vshrl.u32 %v369_v43, %v52_v38  ;;  %v61_v52 = vshrl.u32 %v370_v45, %v52_v38 }
  0x2c   :  { %v64_v53 = vshrl.u32 %v371_v47, %v52_v38  ;;  %v67_v55 = vshrl.u32 %v372_v54, %v52_v38  ;;  %vm70_vm3 = vcmp.lt.s32.totalorder %v50_v37, 2  ;;  %vm71_vm4 = vcmp.lt.s32.totalorder %v50_v37, 3 }
  0x2d   :  { %v56_v57 = vor.u32 %v55_v50, %v54_v40  ;;  %v59_v58 = vor.u32 %v58_v51, %v57_v42  ;;  %v62_v59 = vor.u32 %v61_v52, %v60_v44 }
  0x2e   :  { %v65_v60 = vor.u32 %v64_v53, %v63_v46  ;;  %v68_v61 = vor.u32 %v67_v55, %v66_v48  ;;  %v245_v55 = vmul.f32 %v460_v26, %v406_v6 }
  0x2f   :  { %v73_v62 = vsel %vm69_vm1, %v53_v49, %v56_v57  ;;  %v74_v63 = vsel %vm72_vm2, %v62_v59, 2102212464  ;;  %v77_v0 = vsel %vm69_vm1, %v56_v57, %v59_v58  ;;  %v81_v1 = vsel %vm69_vm1, %v59_v58, %v62_v59 }
  0x30   :  { %v75_v2 = vsel %vm71_vm4, %v59_v58, %v74_v63  ;;  %v78_v3 = vsel %vm72_vm2, %v65_v60, 920167782  ;;  %v82_v4 = vsel %vm72_vm2, %v68_v61, 1326507024  ;;  %v248_v63 = vmul.f32 %v245_v55, %v245_v55 }
  0x31   :  { %v79_v5 = vsel %vm71_vm4, %v62_v59, %v78_v3  ;;  %v83_v9 = vsel %vm71_vm4, %v65_v60, %v82_v4  ;;  %v76_v10 = vsel %vm70_vm3, %v73_v62, %v75_v2  ;;  %v247_v59 = vmul.f32 %v460_v26, %v410_v8 }
  0x32   :  { %v80_v11 = vsel %vm70_vm3, %v77_v0, %v79_v5  ;;  %v84_v12 = vsel %vm70_vm3, %v81_v1, %v83_v9  ;;  %v92_v17 = vmul.u32 %v85_v56, %v76_v10  ;;  %v263_v0 = vsub.f32 0.0, %v245_v55 }
  0x33   :  { %v469_v13 = vmul.u32.u64.low %v85_v56, %v84_v12  ;;  %v470_v14 = vmul.u32.u64.high %v85_v56, %v84_v12, %v469_v13  ;;  %v472_v15 = vmul.u32.u64.low %v85_v56, %v80_v11  ;;  %v473_v16 = vmul.u32.u64.high %v85_v56, %v80_v11, %v472_v15 }
  0x34   :  { %v251_v3 = vmul.f32 %v246_v30, %v245_v55  ;;  %v268_v4 = vsub.f32 0.0, %v246_v30  ;;  %v256_v10 = vmul.f32 %v247_v59, %v245_v55  ;;  %v260_v11 = vmul.f32 %v246_v30, %v246_v30 }
  0x35   :  { %vm94_vm5 = vc.u32 %v470_v14, %v472_v15  ;;  %v95_v18 = vadd.s32 1, %v473_v16  ;;  %v93_v33 = vadd.s32 %v472_v15, %v470_v14  ;;  %v265_v13 = vmul.f32 %v247_v59, %v246_v30 }
  0x36   :  { %v273_v14 = vmul.f32 %v247_v59, %v247_v59 }
  0x37   :  { %v96_v19 = vsel %vm94_vm5, %v95_v18, %v473_v16 }
  0x38   :  { %v97_v20 = vadd.s32 %v96_v19, %v92_v17  ;;  %v278_v19 = vsub.f32 0.0, %v410_v8 }
  0x3a   :  { %v98_v21 = vadd.s32 536870912, %v97_v20 }
  0x3c   :  { %v99_v22 = vshrl.u32 %v98_v21, 30 }
  0x3e   :  { %v100_v23 = vshll.u32 %v99_v22, 30  ;;  %v123_v46 = vsub.s32 4, %v99_v22 }
  0x40   :  { %v101_v25 = vsub.s32 %v97_v20, %v100_v23  ;;  %v124_v49 = vsel %vm39_vm7, %v123_v46, %v99_v22  ;;  %v283_v20 = vsub.f32 0.0, %v406_v6 }
  0x41   :  { %v126_v51 = vsel %vm38_vm8, 0, %v124_v49 }
  0x42   :  { %v103_v28 = vsub.s32 0, %v101_v25  ;;  %v233_v52 = vadd.s32 3, %v126_v51  ;;  %v130_v53 = vand.u32 3, %v126_v51 }
  0x44   :  { %v325_v29 = vmin.u32 %v103_v28, %v101_v25  ;;  %v234_v54 = vand.u32 3, %v233_v52  ;;  %vm135_vm9 = vcmp.eq.s32.totalorder %v130_v53, 2  ;;  %vm132_vm11 = vcmp.eq.s32.totalorder %v130_v53, 0 }
  0x45   :  { %vm131_vm14 = vcmp.lt.s32.totalorder %v130_v53, 2 }
  0x46   :  { %v105_v31 = vclz %v325_v29  ;;  %vm239_vm10 = vcmp.eq.s32.totalorder %v234_v54, 2  ;;  %vm236_vm12 = vcmp.eq.s32.totalorder %v234_v54, 0  ;;  %vm235_vm15 = vcmp.lt.s32.totalorder %v234_v54, 2 }
  0x48   :  { %v326_v32 = vadd.s32 4294967294, %v105_v31  ;;  %v285_v31 = vsub.f32 0.0, %v408_v7 }
  0x4a   :  { %vm327_vm6 = vcmp.lt.s32.totalorder %v326_v32, 0 }
  0x4b   :  { %v108_v34 = vsel %vm327_vm6, 0, %v326_v32 }
  0x4c   :  { %v109_v35 = vsub.s32 32, %v108_v34  ;;  %v110_v36 = vshll.u32 %v101_v25, %v108_v34  ;;  %v113_v37 = vsub.s32 4294967266, %v108_v34 }
  0x4e   :  { %v111_v38 = vshrl.u32 %v93_v33, %v109_v35  ;;  %v114_v39 = vadd.s32 127, %v113_v37 }
  0x50   :  { %v112_v40 = vor.u32 %v111_v38, %v110_v36  ;;  %v115_v41 = vshll.u32 %v114_v39, 23 }
  0x52   :  { %v116_v42 = vor.u32 4788187, %v115_v41  ;;  %v119_v43 = vcvt.s32.f32 %v112_v40 }
  0x54   :  { %v117_v44 = vand.u32 2147483647, %v116_v42 }
  0x56   :  { %v120_v45 = vmul.f32 %v119_v43, %v117_v44 }
  0x58   :  { %v121_v47 = vxor.u32 2147483648, %v120_v45 }
  0x5a   :  { %v122_v48 = vsel %vm39_vm7, %v121_v47, %v120_v45 }
  0x5b   :  { %v125_v50 = vsel %vm38_vm8, %v463_v27, %v122_v48 }
  0x5c   :  { %361 = vcosq.f32 %v125_v50 }
  0x5d   :  { %363 = vsinq.f32 %v125_v50 }
  0x69   :  { %v362_v56 = vpop.eup %361 }
  0x6a   :  { %v364_v57 = vpop.eup %363  ;;  %v136_v58 = vxor.u32 2147483648, %v362_v56 }
  0x6b   :  { %v133_v60 = vxor.u32 2147483648, %v364_v57 }
  0x6c   :  { %v137_v61 = vsel %vm135_vm9, %v136_v58, %v364_v57  ;;  %v241_v62 = vsel %vm239_vm10, %v136_v58, %v364_v57 }
  0x6d   :  { %v134_v1 = vsel %vm132_vm11, %v362_v56, %v133_v60  ;;  %v238_v2 = vsel %vm236_vm12, %v362_v56, %v133_v60 }
  0x6e   :  { %v138_v5 = vsel %vm131_vm14, %v134_v1, %v137_v61  ;;  %v242_v9 = vsel %vm235_vm15, %v238_v2, %v241_v62 }
  0x6f   :  { %v139_v26 = vsel %vm129_vm13, nan, %v138_v5  ;;  %v243_v12 = vsel %vm129_vm13, nan, %v242_v9 }
  0x70   :  { %v244_v15 = vsub.f32 1.0, %v139_v26  ;;  %v253_v16 = vmul.f32 %v247_v59, %v243_v12  ;;  %v255_v17 = vmul.f32 %v246_v30, %v243_v12  ;;  %v264_v18 = vmul.f32 %v263_v0, %v243_v12 }
  0x71   :  { %v269_v21 = vmul.f32 %v268_v4, %v243_v12  ;;  %v271_v22 = vmul.f32 %v245_v55, %v243_v12 }
  0x72   :  { %v249_v23 = vmul.f32 %v248_v63, %v244_v15  ;;  %v252_v25 = vmul.f32 %v251_v3, %v244_v15  ;;  %v257_v28 = vmul.f32 %v256_v10, %v244_v15  ;;  %v261_v29 = vmul.f32 %v260_v11, %v244_v15 }
  0x73   :  { %v266_v27 = vmul.f32 %v265_v13, %v244_v15  ;;  %v274_v32 = vmul.f32 %v273_v14, %v244_v15 }
  0x74   :  { %v250_v33 = vadd.f32 %v249_v23, %v139_v26  ;;  %v254_v34 = vsub.f32 %v252_v25, %v253_v16  ;;  %v258_v35 = vadd.f32 %v257_v28, %v255_v17  ;;  %v259_v36 = vadd.f32 %v253_v16, %v252_v25 }
  0x75   :  { %v262_v37 = vadd.f32 %v261_v29, %v139_v26  ;;  %v267_v38 = vadd.f32 %v266_v27, %v264_v18  ;;  %v270_v39 = vadd.f32 %v269_v21, %v257_v28  ;;  %v272_v40 = vadd.f32 %v271_v22, %v266_v27 }
  0x76   :  { %v277_v41 = vsel %vm276_vm0, %v250_v33, 1.0  ;;  %v279_v42 = vsel %vm276_vm0, %v254_v34, %v278_v19  ;;  %v280_v43 = vsel %vm276_vm0, %v258_v35, %v408_v7  ;;  %v281_v44 = vsel %vm276_vm0, %v259_v36, %v410_v8 }
  0x77   :  { %289 = vst [vmem:[%s548_s2] sm:$0x1] %v277_v41  ;;  %332 = vst [vmem:[%s548_s2 + $0x1] sm:$0x1] %v279_v42  ;;  %v282_v7 = vsel %vm276_vm0, %v262_v37, 1.0  ;;  %v284_v8 = vsel %vm276_vm0, %v267_v38, %v283_v20  ;;  %v286_v45 = vsel %vm276_vm0, %v270_v39, %v285_v31  ;;  %v287_v46 = vsel %vm276_vm0, %v272_v40, %v406_v6 }
  0x78   :  { %333 = vst [vmem:[%s548_s2 + $0x2] sm:$0x1] %v280_v43  ;;  %335 = vst [vmem:[%s548_s2 + $0x4] sm:$0x1] %v281_v44  ;;  %v275_v47 = vadd.f32 %v274_v32, %v139_v26 }
  0x79   :  { %336 = vst [vmem:[%s548_s2 + $0x5] sm:$0x1] %v282_v7  ;;  %337 = vst [vmem:[%s548_s2 + $0x6] sm:$0x1] %v284_v8 }
  0x7a   :  { %339 = vst [vmem:[%s548_s2 + $0x8] sm:$0x1] %v286_v45  ;;  %340 = vst [vmem:[%s548_s2 + $0x9] sm:$0x1] %v287_v46  ;;  %v288_v6 = vsel %vm276_vm0, %v275_v47, 1.0 }
  0x7b   :  { %341 = vst [vmem:[%s548_s2 + $0xa] sm:$0x1] %v288_v6 }

</bundles_post_ra>
